<compile_context>
chip_gen: v7x
topology: tpu7x:2x2x1
jax: 0.10.0
libtpu: 0.0.40
codegen_flags: <defaults>
</compile_context>

<pallas_src>
import functools

import jax
import jax.numpy as jnp
from jax.experimental import pallas as pl
from jax.experimental.pallas import tpu as pltpu

EPS = 1e-5               # nn.GroupNorm default eps
_LANE = 128
_MIB = 1024 * 1024


def _vmem_capacity_bytes():
    # Per-generation VMEM (v5e/v6e: 128 MiB, v7x: 64 MiB per TensorCore).
    try:
        return int(pltpu.get_tpu_info().vmem_capacity_bytes)
    except Exception:
        return 64 * _MIB   # conservative fallback (v7x)


def _resident_footprint_bytes(bt, R, L, itemsize):
    """Estimated VMEM footprint of one resident-path grid step."""
    blk = bt * R * L
    return (4 * blk * itemsize        # x in + out, double-buffered
            + 2 * blk * 4             # in-kernel f32 temporaries (xf, x - mean)
            + 4 * R * _LANE * 4)      # (R,1) params pad to 128 lanes, 2 bufs each


# --------------------------- resident (single call) ---------------------------

def _prenorm_resident_kernel(x_ref, g_ref, b_ref, o_ref, *, inv_n, pad_per_sample):
    # x_ref/o_ref: (bt, R, L) slabs.  g_ref/b_ref: (R, 1) per-row affine params.
    # TODO(synk): for bf16 inputs on v6e/v7x the apply could run in bf16 (cast
    # scale/shift instead of x) to drop the f32 temp; kept f32 for accuracy
    # parity and for v5e (no bf16 VALU).
    xf = x_ref[...].astype(jnp.float32)

    # Mean over the true element count (zero pads contribute 0 to the sum).
    s = jnp.sum(jnp.sum(xf, axis=2, keepdims=True), axis=1, keepdims=True)
    mean = s * inv_n                                           # (bt,1,1)

    # Centered sum of squares (data is VMEM-resident so the extra sweep is free
    # for this HBM-bound kernel; avoids E[x^2]-E[x]^2 cancellation).  Each zero
    # pad contributes mean^2 -> subtract analytically.
    d = xf - mean
    css = jnp.sum(jnp.sum(d * d, axis=2, keepdims=True), axis=1, keepdims=True)
    var = jnp.maximum((css - pad_per_sample * mean * mean) * inv_n, 0.0)
    inv = jax.lax.rsqrt(var + EPS)                             # EUP

    # Fused per-row scale/shift: o = x*scale + shift (2 VPU ops / element).
    g = g_ref[...][None, :, :]                                 # (1,R,1)
    b = b_ref[...][None, :, :]
    scale = g * inv                                            # (bt,R,1)
    shift = b - mean * scale
    o_ref[...] = (xf * scale + shift).astype(o_ref.dtype)


def _resident_call(x2, g_rows, b_rows, *, inv_n, pad_per_sample,
                   x_budget, vmem_headroom, vmem_limit):
    B, R, L = x2.shape
    itemsize = x2.dtype.itemsize
    sample_bytes = R * L * itemsize

    # Batch samples per step under the block budget, but never collapse the
    # grid: keep >= min(B, 4) steps so software pipelining stays active and
    # both v7x TensorCores get work under dimension_semantics=("parallel",).
    min_grid = min(B, 4)
    bt = max(1, min(B, x_budget // sample_bytes, max(1, B // min_grid)))
    while bt > 1 and _resident_footprint_bytes(bt, R, L, itemsize) > vmem_headroom:
        bt -= 1
    # bt need not divide B; a padded trailing batch tile only feeds discarded
    # (out-of-bounds) output rows.
    grid_b = pl.cdiv(B, bt)

    kernel = functools.partial(_prenorm_resident_kernel,
                               inv_n=inv_n, pad_per_sample=pad_per_sample)
    return pl.pallas_call(
        kernel,
        out_shape=jax.ShapeDtypeStruct((B, R, L), x2.dtype),
        grid_spec=pltpu.PrefetchScalarGridSpec(
            num_scalar_prefetch=0,
            grid=(grid_b,),
            in_specs=[
                pl.BlockSpec((bt, R, L), lambda i: (i, 0, 0)),
                pl.BlockSpec((R, 1), lambda i: (0, 0)),   # resident params
                pl.BlockSpec((R, 1), lambda i: (0, 0)),
            ],
            out_specs=pl.BlockSpec((bt, R, L), lambda i: (i, 0, 0)),
        ),
        compiler_params=pltpu.CompilerParams(
            dimension_semantics=("parallel",),
            vmem_limit_bytes=int(vmem_limit),
        ),
        cost_estimate=pl.CostEstimate(
            flops=int(7 * B * R * L),
            transcendentals=int(B),
            bytes_accessed=int(2 * B * R * L * itemsize + 2 * R * 4),
        ),
    )(x2, g_rows, b_rows)


# --------------------- two-pass R-tiled (large samples) ------------------------

def _stats_kernel(x_ref, stats_ref, *, inv_n):
    # x_ref: (1, tr, L) streamed tile.  stats_ref: (1, 2, L) resident accumulator
    # (row 0: sum, row 1: sum-of-squares; finalized in place to mean / inv-std).
    r = pl.program_id(1)
    xf = x_ref[...].astype(jnp.float32)
    s_part = jnp.sum(xf, axis=1, keepdims=True)          # (1,1,L) lane partials
    ss_part = jnp.sum(xf * xf, axis=1, keepdims=True)

    @pl.when(r == 0)
    def _():
        stats_ref[:, 0:1, :] = s_part
        stats_ref[:, 1:2, :] = ss_part

    @pl.when(r != 0)
    def _():
        stats_ref[:, 0:1, :] += s_part
        stats_ref[:, 1:2, :] += ss_part

    @pl.when(r == pl.num_programs(1) - 1)
    def _():
        lanes = x_ref.shape[2]
        s_tot = jnp.sum(stats_ref[:, 0:1, :], axis=2, keepdims=True)   # (1,1,1)
        ss_tot = jnp.sum(stats_ref[:, 1:2, :], axis=2, keepdims=True)
        mean = s_tot * inv_n
        # TODO(synk): E[x^2]-E[x]^2 in f32 can cancel for offset-heavy data; a
        # centered third sweep would fix it at +50% HBM traffic.
        var = jnp.maximum(ss_tot * inv_n - mean * mean, 0.0)
        inv = jax.lax.rsqrt(var + EPS)
        stats_ref[:, 0:1, :] = jnp.broadcast_to(mean, (1, 1, lanes))
        stats_ref[:, 1:2, :] = jnp.broadcast_to(inv, (1, 1, lanes))


def _apply_kernel(x_ref, stats_ref, g_ref, b_ref, o_ref):
    xf = x_ref[...].astype(jnp.float32)    # (1, tr, L)
    stats = stats_ref[...]                 # (1, 2, L): every lane holds the value
    mean = stats[:, 0:1, :]
    inv = stats[:, 1:2, :]
    g = g_ref[...][None, :, :]             # (1, tr, 1)
    b = b_ref[...][None, :, :]
    scale = g * inv                        # (1, tr, L)
    shift = b - mean * scale
    o_ref[...] = (xf * scale + shift).astype(o_ref.dtype)


def _tiled_call(x2, g_rows, b_rows, *, inv_n, x_budget, vmem_limit):
    B, R, L = x2.shape
    itemsize = x2.dtype.itemsize

    # Rows per tile: fill the block budget, multiple of 8 sublanes; pad R with
    # zero rows so the tiling is exact (zero rows contribute nothing to the
    # statistics and their outputs are sliced off).
    tr = max(8, (x_budget // (L * itemsize)) // 8 * 8)
    n_r = pl.cdiv(R, tr)
    r_pad = n_r * tr
    if r_pad != R:
        x2 = jnp.pad(x2, ((0, 0), (0, r_pad - R), (0, 0)))
        g_rows = jnp.pad(g_rows, ((0, r_pad - R), (0, 0)))
        b_rows = jnp.pad(b_rows, ((0, r_pad - R), (0, 0)))

    # Pass 1: accumulate per-sample sum / sumsq across R-tiles (reduction axis
    # last, "arbitrary"; output block index constant over it -> accumulator).
    stats = pl.pallas_call(
        functools.partial(_stats_kernel, inv_n=inv_n),
        out_shape=jax.ShapeDtypeStruct((B, 2, L), jnp.float32),
        grid_spec=pltpu.PrefetchScalarGridSpec(
            num_scalar_prefetch=0,
            grid=(B, n_r),
            in_specs=[pl.BlockSpec((1, tr, L), lambda b, r: (b, r, 0))],
            out_specs=pl.BlockSpec((1, 2, L), lambda b, r: (b, 0, 0)),
        ),
        compiler_params=pltpu.CompilerParams(
            dimension_semantics=("parallel", "arbitrary"),
            vmem_limit_bytes=int(vmem_limit),
        ),
    )(x2)

    # Pass 2: stream R-tiles again and apply the fused per-row scale/shift.
    out = pl.pallas_call(
        _apply_kernel,
        out_shape=jax.ShapeDtypeStruct((B, r_pad, L), x2.dtype),
        grid_spec=pltpu.PrefetchScalarGridSpec(
            num_scalar_prefetch=0,
            grid=(B, n_r),
            in_specs=[
                pl.BlockSpec((1, tr, L), lambda b, r: (b, r, 0)),
                pl.BlockSpec((1, 2, L), lambda b, r: (b, 0, 0)),
                pl.BlockSpec((tr, 1), lambda b, r: (r, 0)),
                pl.BlockSpec((tr, 1), lambda b, r: (r, 0)),
            ],
            out_specs=pl.BlockSpec((1, tr, L), lambda b, r: (b, r, 0)),
        ),
        compiler_params=pltpu.CompilerParams(
            dimension_semantics=("parallel", "parallel"),
            vmem_limit_bytes=int(vmem_limit),
        ),
        cost_estimate=pl.CostEstimate(
            flops=int(4 * B * r_pad * L),
            transcendentals=0,
            bytes_accessed=int(2 * B * r_pad * L * itemsize),
        ),
    )(x2, stats, g_rows, b_rows)
    return out[:, :R, :]


# --------------------------------- wrapper ------------------------------------

def group_norm_1group(x, gamma, beta, *, max_x_block_bytes=None):
    """GroupNorm(num_groups=1, num_channels=C) on NCHW input via Pallas TPU."""
    B, C, H, W = x.shape
    HW = H * W
    n_real = C * HW
    inv_n = 1.0 / float(n_real)
    itemsize = x.dtype.itemsize

    # Per-generation VMEM budgeting.
    vmem_cap = _vmem_capacity_bytes()
    vmem_limit = max(16 * _MIB, min(int(0.75 * vmem_cap), 96 * _MIB))
    vmem_headroom = vmem_limit - 2 * _MIB
    x_budget = max(2 * _MIB, min(8 * _MIB, vmem_cap // 16))   # ~8 MiB v5e/v6e, ~4 MiB v7x
    if max_x_block_bytes is not None:                         # test hook
        x_budget = int(max_x_block_bytes)

    # Lane-dense slab: pad HW up to a multiple of 128 with zeros so every load
    # and store is a full, unmasked 128-lane access; the pad is sliced off at
    # the end and the statistics use the true element count.
    hw_pad = pl.cdiv(HW, _LANE) * _LANE
    rows_per_c = hw_pad // _LANE
    R, L = C * rows_per_c, _LANE
    x2 = x.reshape(B, C, HW)
    if hw_pad != HW:
        x2 = jnp.pad(x2, ((0, 0), (0, 0), (0, hw_pad - HW)))
    x2 = x2.reshape(B, R, L)
    pad_per_sample = float(R * L - n_real)

    # Per-row affine params (channel c owns rows_per_c consecutive rows).
    g_rows = jnp.repeat(gamma.astype(jnp.float32), rows_per_c).reshape(R, 1)
    b_rows = jnp.repeat(beta.astype(jnp.float32), rows_per_c).reshape(R, 1)

    sample_bytes = R * L * itemsize
    fits_resident = (sample_bytes <= x_budget and
                     _resident_footprint_bytes(1, R, L, itemsize) <= vmem_headroom)

    if fits_resident:
        out = _resident_call(x2, g_rows, b_rows, inv_n=inv_n,
                             pad_per_sample=pad_per_sample, x_budget=x_budget,
                             vmem_headroom=vmem_headroom, vmem_limit=vmem_limit)
    else:
        out = _tiled_call(x2, g_rows, b_rows, inv_n=inv_n,
                          x_budget=x_budget, vmem_limit=vmem_limit)

    return out.reshape(B, C, hw_pad)[:, :, :HW].reshape(B, C, H, W)


def pre_norm(x, gamma, beta, fn=lambda y: y):
    # TODO(synk): `fn` is the arbitrary wrapped module (e.g. Attention /
    # ConvNeXt block) supplied at construction in PyTorch; it is applied as a
    # plain JAX callable outside the norm kernel.
    return fn(group_norm_1group(x, gamma, beta))


if __name__ == "__main__":
    key = jax.random.PRNGKey(0)
    k_x, k_g, k_b = jax.random.split(key, 3)

    def ref_groupnorm(x, gamma, beta):
        C = x.shape[1]
        mean = jnp.mean(x, axis=(1, 2, 3), keepdims=True)
        var = jnp.mean((x - mean) ** 2, axis=(1, 2, 3), keepdims=True)
        y = (x - mean) * jax.lax.rsqrt(var + EPS)
        return y * gamma.reshape(1, C, 1, 1) + beta.reshape(1, C, 1, 1)

    # Case 1: demo shape (lane-aligned HW) -> resident single-pass path.
    B, C, H, W = 2, 4, 16, 16
    x = jax.random.normal(k_x, (B, C, H, W), dtype=jnp.float32)
    gamma = 1.0 + 0.1 * jax.random.normal(k_g, (C,), dtype=jnp.float32)
    beta = 0.1 * jax.random.normal(k_b, (C,), dtype=jnp.float32)
    out = jax.block_until_ready(pre_norm(x, gamma, beta))
    assert jnp.allclose(out, ref_groupnorm(x, gamma, beta),
                        atol=2e-5, rtol=2e-5), "resident path mismatch"

    # Case 2: HW not a multiple of 128 -> host zero-pad keeps lane-dense stores.
    x2 = jax.random.normal(k_x, (2, 3, 10, 10), dtype=jnp.float32)
    g2 = 1.0 + 0.1 * jax.random.normal(k_g, (3,), dtype=jnp.float32)
    b2 = 0.1 * jax.random.normal(k_b, (3,), dtype=jnp.float32)
    out2 = jax.block_until_ready(group_norm_1group(x2, g2, b2))
    assert jnp.allclose(out2, ref_groupnorm(x2, g2, b2),
                        atol=2e-5, rtol=2e-5), "padded-HW path mismatch"

    # Case 3: force the two-pass R-tiled streaming path (samples larger than
    # the block budget, e.g. big C*H*W on v7x) with a tiny test budget.
    x3 = jax.random.normal(k_x, (2, 3, 32, 32), dtype=jnp.float32)
    out3 = jax.block_until_ready(
        group_norm_1group(x3, g2, b2, max_x_block_bytes=8192))
    assert jnp.allclose(out3, ref_groupnorm(x3, g2, b2),
                        atol=2e-5, rtol=2e-5), "tiled path mismatch"

    print("KERNEL_OK")
</pallas_src>

<mosaic_0001>
module attributes {stable_mosaic.version = 11 : i64} {
  func.func @_prenorm_resident_kernel(%arg0: i32, %arg1: memref<1x8x128xf32, #tpu.memory_space<vmem>>, %arg2: memref<8x1xf32, #tpu.memory_space<vmem>>, %arg3: memref<8x1xf32, #tpu.memory_space<vmem>>, %arg4: memref<1x8x128xf32, #tpu.memory_space<vmem>>) attributes {dimension_semantics = [#tpu.dimension_semantics<parallel>], iteration_bounds = array<i64: 2>, scalar_prefetch = 0 : i64, scratch_operands = 0 : i64, tpu.core_type = #tpu.core_type<tc>, window_params = [{transform_indices = @transform_0, window_bounds = array<i64: 1, 8, 128>}, {pipeline_mode = #tpu.pipeline_mode<synchronous>, transform_indices = @transform_1, window_bounds = array<i64: 8, 1>}, {pipeline_mode = #tpu.pipeline_mode<synchronous>, transform_indices = @transform_2, window_bounds = array<i64: 8, 1>}, {transform_indices = @transform_3, window_bounds = array<i64: 1, 8, 128>}]} {
    %c0 = arith.constant 0 : index
    %c0_0 = arith.constant 0 : index
    %c0_1 = arith.constant 0 : index
    %0 = vector.load %arg1[%c0, %c0_0, %c0_1] : memref<1x8x128xf32, #tpu.memory_space<vmem>>, vector<1x8x128xf32>
    %cst = arith.constant dense<0.000000e+00> : vector<1x8xf32>
    %1 = vector.multi_reduction <add>, %0, %cst [2] : vector<1x8x128xf32> to vector<1x8xf32>
    %2 = vector.shape_cast %1 : vector<1x8xf32> to vector<1x8x1xf32>
    %cst_2 = arith.constant dense<0.000000e+00> : vector<1x1xf32>
    %3 = vector.multi_reduction <add>, %2, %cst_2 [1] : vector<1x8x1xf32> to vector<1x1xf32>
    %4 = vector.shape_cast %3 : vector<1x1xf32> to vector<1x1x1xf32>
    %cst_3 = arith.constant 9.765625E-4 : f32
    %5 = vector.broadcast %cst_3 : f32 to vector<1x1x1xf32>
    %6 = arith.mulf %4, %5 : vector<1x1x1xf32>
    %7 = vector.broadcast %6 : vector<1x1x1xf32> to vector<1x8x128xf32>
    %8 = arith.subf %0, %7 : vector<1x8x128xf32>
    %9 = arith.mulf %8, %8 : vector<1x8x128xf32>
    %cst_4 = arith.constant dense<0.000000e+00> : vector<1x8xf32>
    %10 = vector.multi_reduction <add>, %9, %cst_4 [2] : vector<1x8x128xf32> to vector<1x8xf32>
    %11 = vector.shape_cast %10 : vector<1x8xf32> to vector<1x8x1xf32>
    %cst_5 = arith.constant dense<0.000000e+00> : vector<1x1xf32>
    %12 = vector.multi_reduction <add>, %11, %cst_5 [1] : vector<1x8x1xf32> to vector<1x1xf32>
    %13 = vector.shape_cast %12 : vector<1x1xf32> to vector<1x1x1xf32>
    %cst_6 = arith.constant 0.000000e+00 : f32
    %14 = vector.broadcast %cst_6 : f32 to vector<1x1x1xf32>
    %15 = arith.mulf %14, %6 : vector<1x1x1xf32>
    %16 = arith.mulf %15, %6 : vector<1x1x1xf32>
    %17 = arith.subf %13, %16 : vector<1x1x1xf32>
    %cst_7 = arith.constant 9.765625E-4 : f32
    %18 = vector.broadcast %cst_7 : f32 to vector<1x1x1xf32>
    %19 = arith.mulf %17, %18 : vector<1x1x1xf32>
    %cst_8 = arith.constant 0.000000e+00 : f32
    %20 = vector.broadcast %cst_8 : f32 to vector<1x1x1xf32>
    %21 = arith.maximumf %19, %20 : vector<1x1x1xf32>
    %cst_9 = arith.constant 9.99999974E-6 : f32
    %22 = vector.broadcast %cst_9 : f32 to vector<1x1x1xf32>
    %23 = arith.addf %21, %22 : vector<1x1x1xf32>
    %24 = math.rsqrt %23 : vector<1x1x1xf32>
    %c0_10 = arith.constant 0 : index
    %c0_11 = arith.constant 0 : index
    %25 = vector.load %arg2[%c0_10, %c0_11] : memref<8x1xf32, #tpu.memory_space<vmem>>, vector<8x1xf32>
    %26 = vector.shape_cast %25 : vector<8x1xf32> to vector<1x8x1xf32>
    %c0_12 = arith.constant 0 : index
    %c0_13 = arith.constant 0 : index
    %27 = vector.load %arg3[%c0_12, %c0_13] : memref<8x1xf32, #tpu.memory_space<vmem>>, vector<8x1xf32>
    %28 = vector.shape_cast %27 : vector<8x1xf32> to vector<1x8x1xf32>
    %29 = vector.broadcast %24 : vector<1x1x1xf32> to vector<1x8x1xf32>
    %30 = arith.mulf %26, %29 : vector<1x8x1xf32>
    %31 = vector.broadcast %6 : vector<1x1x1xf32> to vector<1x8x1xf32>
    %32 = arith.mulf %31, %30 : vector<1x8x1xf32>
    %33 = arith.subf %28, %32 : vector<1x8x1xf32>
    %34 = vector.broadcast %30 : vector<1x8x1xf32> to vector<1x8x128xf32>
    %35 = arith.mulf %0, %34 : vector<1x8x128xf32>
    %36 = vector.broadcast %33 : vector<1x8x1xf32> to vector<1x8x128xf32>
    %37 = arith.addf %35, %36 : vector<1x8x128xf32>
    %c0_14 = arith.constant 0 : index
    %c0_15 = arith.constant 0 : index
    %c0_16 = arith.constant 0 : index
    %38 = vector.load %arg4[%c0_14, %c0_15, %c0_16] : memref<1x8x128xf32, #tpu.memory_space<vmem>>, vector<1x8x128xf32>
    tpu.vector_store %arg4[%c0_14, %c0_15, %c0_16], %37 {strides = array<i32>} : memref<1x8x128xf32, #tpu.memory_space<vmem>>, vector<1x8x128xf32>,
    return
  }
  func.func @transform_0(%arg0: i32) -> (i32, i32, i32) {
    %c0_i32 = arith.constant 0 : i32
    %c0_i32_0 = arith.constant 0 : i32
    %c0_i32_1 = arith.constant 0 : i32
    return %arg0, %c0_i32, %c0_i32_0 : i32, i32, i32
  }
  func.func @transform_1(%arg0: i32) -> (i32, i32) {
    %c0_i32 = arith.constant 0 : i32
    %c0_i32_0 = arith.constant 0 : i32
    %c0_i32_1 = arith.constant 0 : i32
    return %c0_i32, %c0_i32_0 : i32, i32
  }
  func.func @transform_2(%arg0: i32) -> (i32, i32) {
    %c0_i32 = arith.constant 0 : i32
    %c0_i32_0 = arith.constant 0 : i32
    %c0_i32_1 = arith.constant 0 : i32
    return %c0_i32, %c0_i32_0 : i32, i32
  }
  func.func @transform_3(%arg0: i32) -> (i32, i32, i32) {
    %c0_i32 = arith.constant 0 : i32
    %c0_i32_0 = arith.constant 0 : i32
    %c0_i32_1 = arith.constant 0 : i32
    return %arg0, %c0_i32, %c0_i32_0 : i32, i32, i32
  }
}

</mosaic_0001>

<bundles_post_ra>
// kernel: tpu_custom_call.1
= control target key start
LH: loop header
LB: loop body
LE: loop exit
PB: predicated region body
PF: predicated region fallthrough
CT: control target
= control target key end

     0   :  { %8 = vsyncpa [#allocation3], 0  ;;  %s530_s0 = inlined_call_operand.vmem [shape: f32[2,8,128], index: 0, kind: input, shape index: {}]   ;;  %s531_s1 = inlined_call_operand.vmem [shape: f32[8,1], index: 1, kind: input, shape index: {}]   ;;  %s532_s2 = inlined_call_operand.vmem [shape: f32[8,1], index: 2, kind: input, shape index: {}]   ;;  %s533_s3 = inlined_call_operand.hbm [shape: f32[2,8,128], index: 3, kind: output, shape index: {}]  }
   0x1   :  { %10 = vsyncpa [#allocation3 + $0x1], 0  ;;  %s424_s12 = smov 0   ;;  %s426_s13 = smov 0  }
   0x2   :  { %s428_s14 = smov 0   ;;  %s430_s15 = smov 0  }
   0x3 LB: > { %s445_s16 = sadd.s32 4294967295, %s400_s15   ;;  %s284_s17 = sadd.s32 4294967294, %s400_s15   ;;  %s400_s15 = sphi %s430_s15, %s539_s15   ;;  %s396_s14 = sphi %s428_s14, %s538_s14   ;;  %s392_s13 = sphi %s426_s13, %s537_s13   ;;  %s388_s12 = sphi %s424_s12, %s536_s12  }
   0x4   : > { %s449_s18 = sadd.s32 1, %s400_s15   ;;  %s91_s19 = sadd.s32 1, %s396_s14 }
   0x5   : > { %s88_s20 = ssub.s32 %s400_s15, %s449_s18  ;;  %p101_p0 = scmp.ne.s32.totalorder %s396_s14, %s392_s13 }
   0x6   : > { %p89_p1 = scmp.eq.s32.totalorder %s88_s20, 0  ;;  %p102_p2 = scmp.eq.s32.totalorder %s445_s16, 1 }
   0x7   : > { %p107_p3 = scmp.ne.s32.totalorder %s392_s13, %s388_s12  ;;  %p108_p4 = scmp.eq.s32.totalorder %s284_s17, 1 }
   0x8   : > { %s460_s21 = scalar_select %p89_p1, %s396_s14, %s91_s19  }
   0x9   : > { %p462_p5 = por %p102_p2, %p101_p0  ;;  %p466_p6 = por %p108_p4, %p107_p3 }
   0xa   : > { %p287_p7 = scmp.ge.s32.totalorder %s400_s15, 1  ;;  %p139_p8 = scmp.lt.s32.totalorder %s400_s15, 3 }
   0xc   : > { %p140_p9 = pnand %p287_p7, %p139_p8 }
   0xd   : > { %p162_p10 = scmp.lt.s32.totalorder (!%p140_p9), %s445_s16, 1  ;;  %v402_v11 = vmov (!%p140_p9), 0   ;;  %v193_v25 = vld [vmem:[%s531_s1] sm:$0xff] (!%p140_p9)  ;;  %s159_s6 = sand.u32 (!%p140_p9), 1, %s392_s13  }
   0xe   : > { %143 = sbr.rel (%p140_p9) target bundleno = 509 (0x1fd), region = 32  ;;  %334 = vset.pattern.permute.xlu1 (!%p140_p9), %v402_v11  ;;  %335 = vset.pattern.permute.xlu0 (!%p140_p9), %v402_v11  ;;  %v194_v28 = vld [vmem:[%s532_s2] sm:$0xff] (!%p140_p9)  ;;  %s288_s7 = sshll.u32 (!%p140_p9), %s159_s6, 3 }
   0xf   : > { %s291_s8 = sshll.u32 (!%p140_p9), %s445_s16, 7  ;;  %s161_s9 = scalar_lea.vmem (!%p140_p9), [#allocation2], %s288_s7 }
  0x10   : > { %s225_s10 = sshll.u32 (!%p140_p9), %s161_s9, 4  ;;  %s488_s19 = scalar_lea.hbm (!%p140_p9), %s533_s3, %s291_s8  ;;  %s490_s10 = int_to_ptr.vmem [resolvable:$true] %s225_s10 }
  0x11   : > { %s212_s20 = scalar_lea.sflag (!%p140_p9), [#allocation3], %s159_s6 }
  0x15   : > { %s163_s24 = scalar_select %p162_p10, %s445_s16, 1 }
  0x16   : > { %s403_s16 = smov [#allocation2]  }
  0x17   : > { %s289_s25 = sshll.u32 %s163_s24, 3  ;;  %s338_s24 = scalar_lea.vmem %s490_s10, 128 }
  0x18   : > { %s165_s28 = scalar_lea.vmem %s530_s0, %s289_s25  ;;  %p339_p11 = scmp.ne.s32.totalorder %s490_s10, %s338_s24 }
  0x19   : > { %v166_v0 = vld [vmem:[%s165_s28] sm:$0xff]  ;;  %s342_s25 = sshll.u32 %s403_s16, 4  ;;  %s343_s25 = int_to_ptr.vmem [resolvable:$false] %s342_s25 }
  0x1a   : > { %167 = vadd.xlane.f32.xlu0 %v166_v0  ;;  %p340_p12 = pnand %p339_p11, %p462_p5  ;;  %s344_s26 = scalar_lea.vmem %s343_s25, 256 }
  0x1b   : > { %p345_p0 = scmp.lt.s32.totalorder %s490_s10, %s343_s25  ;;  %p346_p1 = scmp.lt.s32.totalorder %s344_s26, %s338_s24 }
  0x1c   : > { %p341_p13 = pneg %p340_p12 }
  0x1d   : > { %p347_p2 = por %p346_p1, %p345_p0 }
  0x1f   : > { %p348_p3 = pnand %p347_p2, %p341_p13 }
  0xa7   : > { %v168_v1 = vpop.xlane.xlu0 %167 }
  0xa8   : > { %v169_v2 = vrot.slane %v168_v1, 4 }
  0xaa   : > { %v170_v3 = vadd.f32 %v169_v2, %v168_v1 }
  0xac   : > { %v171_v4 = vrot.slane %v170_v3, 2 }
  0xae   : > { %v172_v5 = vadd.f32 %v171_v4, %v170_v3 }
  0xb0   : > { %v173_v6 = vrot.slane %v172_v5, 1 }
  0xb2   : > { %v174_v7 = vadd.f32 %v173_v6, %v172_v5 }
  0xb4   : > { %v175_v8 = vmul.f32 0.0009765625, %v174_v7 }
  0xb6   : > { %v176_v9 = vsub.f32 %v166_v0, %v175_v8  ;;  %v186_v16 = vmul.f32 0.0, %v175_v8 }
  0xb8   : > { %v177_v10 = vmul.f32 %v176_v9, %v176_v9  ;;  %v187_v19 = vmul.f32 %v186_v16, %v175_v8 }
  0xba   : > { %178 = vadd.xlane.f32.xlu0 %v177_v10 }
 0x147   : > { %v179_v12 = vpop.xlane.xlu0 %178 }
 0x148   : > { %v180_v13 = vrot.slane %v179_v12, 4 }
 0x14a   : > { %v181_v14 = vadd.f32 %v180_v13, %v179_v12 }
 0x14c   : > { %v182_v15 = vrot.slane %v181_v14, 2 }
 0x14e   : > { %v183_v17 = vadd.f32 %v182_v15, %v181_v14 }
 0x150   : > { %v184_v18 = vrot.slane %v183_v17, 1 }
 0x152   : > { %v185_v20 = vadd.f32 %v184_v18, %v183_v17 }
 0x154   : > { %v188_v21 = vsub.f32 %v185_v20, %v187_v19 }
 0x156   : > { %v189_v22 = vmul.f32 0.0009765625, %v188_v21 }
 0x158   : > { %v190_v23 = vmax.f32 %v189_v22, 0.0 }
 0x15a   : > { %v191_v24 = vadd.f32 1e-05, %v190_v23 }
 0x15c   : > { %336 = vrsqrt.f32 %v191_v24 }
 0x166   : > { %v337_v26 = vpop.eup %336 }
 0x167   : > { %v195_v27 = vmul.f32 %v337_v26, %v193_v25 }
 0x169   : > { %200 = vperm.xlu1 %334, %v195_v27   ;;  %v196_v29 = vmul.f32 %v195_v27, %v175_v8 }
 0x16b   : > { %v197_v30 = vsub.f32 %v194_v28, %v196_v29 }
 0x16d   : > { %206 = vperm.xlu1 %334, %v197_v30  }
 0x1e8   : > { %v201_v31 = vpop.permute.xlu1 %200 }
 0x1e9   : > { %v203_v32 = vmul.f32 %v201_v31, %v166_v0 }
 0x1ec   : > { %v207_v33 = vpop.permute.xlu1 %206 }
 0x1ed   : > { %v209_v34 = vadd.f32 %v207_v33, %v203_v32 }
 0x1ef   : > { %210 = vst [vmem:[%s161_s9] sm:$0xff] %v209_v34 }
 0x1f0   : > { %351 = shalt.err (!%p348_p3)
}
 0x1f1   : > { %s352_s27 = scalar_lea.hbm %s488_s19, 128  ;;  %s356_s30 = scalar_lea.hbm %s533_s3, 256 }
 0x1f2   : > { %p353_p4 = scmp.ne.s32.totalorder %s488_s19, %s352_s27  ;;  %p357_p9 = scmp.lt.u32.totalorder %s488_s19, %s533_s3 }
 0x1f3   : > { %p358_p10 = scmp.lt.u32.totalorder %s356_s30, %s352_s27  ;;  %p360_p12 = scmp.lt.u32.totalorder %s352_s27, %s488_s19 }
 0x1f4   : > { %p354_p7 = pnand %p353_p4, %p462_p5 }
 0x1f5   : > { %p359_p11 = por %p358_p10, %p357_p9 }
 0x1f6   : > { %p355_p8 = pneg %p354_p7 }
 0x1f7   : > { %p361_p13 = por %p360_p12, %p359_p11 }
 0x1f9   : > { %p362_p0 = pnand %p361_p13, %p355_p8 }
 0x1fb   : > { %365 = shalt.err (!%p362_p0)
}
 0x1fc   : > { %294 = dma.vmem_to_hbm [thread:$0]  (%p462_p5), %s490_s10, 128, %s488_s19, %s212_s20  }
 0x1fd PF: > { %p300_p1 = scmp.ge.s32.totalorder %s400_s15, 2  ;;  %s237_s6 = sand.u32 1, %s388_s12  }
 0x1fe   : > { %s238_s7 = scalar_lea.sflag [#allocation3], %s237_s6 }
 0x1ff   : > { %p297_p2 = pnand %p300_p1, %p466_p6 }
 0x201   : > { %383 = dma.done.wait (!%p297_p2), %s238_s7, 128  }
 0x202   : > { %385 = vsyncadd (!%p297_p2), %s238_s7, 4294967168  ;;  %p13_p3 = scmp.ge.s32.totalorder %s449_s18, 4   ;;  %s536_s12 = smov %s392_s13 }
 0x203   : > { %s537_s13 = smov %s396_s14  ;;  %s538_s14 = smov %s460_s21 }
 0x204   : > { %s539_s15 = smov %s449_s18  ;;  %15 = sbr.rel (!%p13_p3) target bundleno = 3 (0x3), region = 67 }
 0x20b   :  { %243 = vsyncpa [#allocation3], 1 }
 0x20c   :  { %245 = vsyncpa [#allocation3 + $0x1], 1 }

</bundles_post_ra>
